<compile_context>
chip_gen: v5e
topology: v5e:2x2
jax: 0.10.0
libtpu: 0.0.40
codegen_flags: <defaults>
</compile_context>

<pallas_src>
import math

import jax
import jax.numpy as jnp
from jax.experimental import pallas as pl
from jax.experimental.pallas import tpu as pltpu


def _round_up(n: int, m: int) -> int:
    return ((n + m - 1) // m) * m


def _vmem_capacity_bytes() -> int:
    """Per-core VMEM capacity; conservative 64 MiB (v7x) fallback."""
    try:
        info = pltpu.get_tpu_info()
        cap = getattr(info, "vmem_capacity_bytes", None)
        if cap:
            return int(cap)
    except Exception:
        pass
    return 64 * 1024 * 1024


def _make_kernel(approximate_gelu: bool):
    inv_sqrt2 = 1.0 / math.sqrt(2.0)

    def kernel(scales_ref, x_ref, w1_ref, b1_ref, w2_ref, b2_ref, o_ref, acc_ref):
        # grid = (batch_tiles, hid_tiles); hid axis is the (inner) reduction axis.
        k = pl.program_id(1)

        @pl.when(k == 0)
        def _init():
            acc_ref[...] = jnp.zeros_like(acc_ref)

        # weight-norm scalars (g / ||v||_F) live in SMEM (scalar prefetch).
        s1 = scales_ref[0]
        s2 = scales_ref[1]

        # Linear 1 (this hid tile): raw v1.T on the MXU, f32 acc, scale folded in.
        h = (jnp.dot(x_ref[...], w1_ref[...], preferred_element_type=jnp.float32) * s1
             + b1_ref[...])

        # GELU in f32 (exact erf matches torch.nn.GELU(); tanh variant uses EUP).
        if approximate_gelu:
            h = jax.nn.gelu(h, approximate=True)
        else:
            h = 0.5 * h * (1.0 + jax.lax.erf(h * inv_sqrt2))

        # Dropout(p=0.0) is the identity.

        # Linear 2 partial contribution of this hid tile (cast for full-rate MXU).
        h = h.astype(w2_ref.dtype)
        acc_ref[...] += jnp.dot(h, w2_ref[...], preferred_element_type=jnp.float32) * s2

        @pl.when(k == pl.num_programs(1) - 1)
        def _finalize():
            o_ref[...] = (acc_ref[...] + b2_ref[...]).astype(o_ref.dtype)

    return kernel


def facilitator_forward(x, w1_v, w1_g, b1, w2_v, w2_g, b2, *,
                        block_rows=512, compute_dtype=jnp.bfloat16,
                        out_dtype=None, approximate_gelu=False, hid_block=None):
    """x: (B, in_dim). w*_v: PyTorch Linear layout (out_features, in_features).

    weight_norm(dim=None): w = g * v / ||v||_F (scalar g, Frobenius norm).
    The scalar is applied in-kernel; raw v.T goes through the MXU.
    """
    B, in_dim = x.shape
    hid_dim = w1_v.shape[0]
    out_dim = w2_v.shape[0]

    compute_dtype = jnp.dtype(compute_dtype)
    out_dtype = jnp.dtype(x.dtype if out_dtype is None else out_dtype)
    cbytes = compute_dtype.itemsize
    obytes = out_dtype.itemsize

    # Lane-dense padding: every last dim a multiple of 128.
    in_p = _round_up(in_dim, 128)
    hid_p = _round_up(hid_dim, 128)
    out_p = _round_up(out_dim, 128)

    # Generation-aware VMEM budget (v5e/v6e: 128 MiB; v7x: 64 MiB per core).
    cap = _vmem_capacity_bytes()
    tile_budget = int(cap * 0.70)
    vmem_limit = min(int(cap * 0.85), cap)

    def _weights_bytes(ht, nbuf):
        return nbuf * ((in_p * ht + ht * out_p) * cbytes + (ht + out_p) * 4)

    # --- hidden-dim tiling: only tile (and double-buffer) W1/W2 when the full
    # weights would not fit comfortably as a single-buffered residency.
    if hid_block is not None:
        hid_tile = min(hid_p, max(128, _round_up(int(hid_block), 128)))
    else:
        hid_tile = hid_p
        while hid_tile > 128:
            nbuf = 1 if hid_tile == hid_p else 2
            if _weights_bytes(hid_tile, nbuf) <= tile_budget // 2:
                break
            new_ht = max(128, _round_up((hid_tile + 1) // 2, 128))
            if new_ht == hid_tile:
                break
            hid_tile = new_ht
    hid_p = _round_up(hid_p, hid_tile)        # zero-padded hid columns contribute 0
    n_hid = hid_p // hid_tile
    w_buf = 1 if n_hid == 1 else 2

    # --- batch tiling: big, multiple of 8 sublanes, and >= 2 tiles when possible
    # so the "parallel" batch axis can be split across megacore TensorCores.
    block_rows = max(8, _round_up(min(int(block_rows), _round_up(B, 8)), 8))
    if B >= 16:
        block_rows = min(block_rows, _round_up((B + 1) // 2, 8))

    def _vmem_est(br):
        return (2 * br * in_p * cbytes                 # x tiles (double-buffered)
                + 2 * br * out_p * obytes              # out tiles (double-buffered)
                + _weights_bytes(hid_tile, w_buf)      # W1/W2 + biases
                + br * out_p * 4                       # f32 accumulator scratch
                + br * hid_tile * 4)                   # f32 intermediate
    while block_rows > 8 and _vmem_est(block_rows) > tile_budget:
        block_rows = max(8, (block_rows // 2) // 8 * 8)

    Bp = _round_up(B, block_rows)
    grid = (Bp // block_rows, n_hid)

    # Weight-norm scalars (Frobenius norm of the *raw* v; zero padding preserves it).
    s1 = (w1_g / jnp.linalg.norm(w1_v)).astype(jnp.float32).reshape(())
    s2 = (w2_g / jnp.linalg.norm(w2_v)).astype(jnp.float32).reshape(())
    scales = jnp.stack([s1, s2])  # (2,) f32, scalar-prefetched into SMEM

    # Raw (transposed) weights, zero-padded & cast to the MXU operand dtype.
    v1t = jnp.zeros((in_p, hid_p), compute_dtype).at[:in_dim, :hid_dim].set(
        w1_v.T.astype(compute_dtype))
    v2t = jnp.zeros((hid_p, out_p), compute_dtype).at[:hid_dim, :out_dim].set(
        w2_v.T.astype(compute_dtype))
    b1p = jnp.zeros((1, hid_p), jnp.float32).at[0, :hid_dim].set(b1.astype(jnp.float32))
    b2p = jnp.zeros((1, out_p), jnp.float32).at[0, :out_dim].set(b2.astype(jnp.float32))

    # Only materialize a padded HBM copy of x when actually required.
    xp = x if x.dtype == compute_dtype else x.astype(compute_dtype)
    if (Bp != B) or (in_p != in_dim):
        xp = jnp.zeros((Bp, in_p), compute_dtype).at[:B, :in_dim].set(xp)

    # Single-buffer weights/biases when their block index is grid-constant.
    w_mode = pl.Buffered(1) if w_buf == 1 else None

    def _spec(shape, index_map, mode):
        if mode is None:
            return pl.BlockSpec(shape, index_map)
        return pl.BlockSpec(shape, index_map, pipeline_mode=mode)

    n_b_tiles = Bp // block_rows
    cost = pl.CostEstimate(
        flops=2 * Bp * (in_p * hid_p + hid_p * out_p),
        transcendentals=Bp * hid_p,  # erf / tanh
        bytes_accessed=(Bp * in_p * cbytes
                        + (n_b_tiles if n_hid > 1 else 1)
                        * (in_p * hid_p + hid_p * out_p) * cbytes
                        + (hid_p + out_p) * 4
                        + Bp * out_p * obytes),
    )

    # TODO(synk): optionally sweep pl.Buffered(3) on the x/out specs on v7x.
    out_padded = pl.pallas_call(
        _make_kernel(approximate_gelu),
        out_shape=jax.ShapeDtypeStruct((Bp, out_p), out_dtype),
        grid_spec=pltpu.PrefetchScalarGridSpec(
            num_scalar_prefetch=1,           # `scales` -> SMEM
            grid=grid,
            in_specs=[
                pl.BlockSpec((block_rows, in_p), lambda i, k, s: (i, 0)),   # x tile
                _spec((in_p, hid_tile), lambda i, k, s: (0, k), w_mode),    # v1.T tile
                _spec((1, hid_tile), lambda i, k, s: (0, k), w_mode),       # b1 tile
                _spec((hid_tile, out_p), lambda i, k, s: (k, 0), w_mode),   # v2.T tile
                _spec((1, out_p), lambda i, k, s: (0, 0), pl.Buffered(1)),  # b2
            ],
            out_specs=pl.BlockSpec((block_rows, out_p), lambda i, k, s: (i, 0)),
            scratch_shapes=[pltpu.VMEM((block_rows, out_p), jnp.float32)],
        ),
        compiler_params=pltpu.CompilerParams(
            dimension_semantics=("parallel", "arbitrary"),
            vmem_limit_bytes=vmem_limit,
        ),
        cost_estimate=cost,
    )(scales, xp, v1t, b1p, v2t, b2p)

    if Bp == B and out_p == out_dim:
        return out_padded
    return out_padded[:B, :out_dim]


def facilitator_reference(x, w1_v, w1_g, b1, w2_v, w2_g, b2):
    w1 = w1_g * w1_v / jnp.linalg.norm(w1_v)
    w2 = w2_g * w2_v / jnp.linalg.norm(w2_v)
    h = x @ w1.T + b1
    h = 0.5 * h * (1.0 + jax.lax.erf(h / jnp.sqrt(2.0)))
    return h @ w2.T + b2


if __name__ == "__main__":
    key = jax.random.PRNGKey(0)
    (k_x, k_w1, k_b1, k_w2, k_b2,
     k_x2, k_w1b, k_b1b, k_w2b, k_b2b, k_x4) = jax.random.split(key, 11)

    # --- Facilitator(in_dim=32, hid_dim=64, out_dim=32), batch=8 ---
    batch, in_dim, hid_dim, out_dim = 8, 32, 64, 32
    x = jax.random.normal(k_x, (batch, in_dim), dtype=jnp.float32)

    bound1 = 1.0 / math.sqrt(in_dim)
    w1_v = jax.random.uniform(k_w1, (hid_dim, in_dim), jnp.float32, -bound1, bound1)
    b1 = jax.random.uniform(k_b1, (hid_dim,), jnp.float32, -bound1, bound1)
    w1_g = jnp.linalg.norm(w1_v)          # weight_norm init: g = ||v||

    bound2 = 1.0 / math.sqrt(hid_dim)
    w2_v = jax.random.uniform(k_w2, (out_dim, hid_dim), jnp.float32, -bound2, bound2)
    b2 = jax.random.uniform(k_b2, (out_dim,), jnp.float32, -bound2, bound2)
    w2_g = jnp.linalg.norm(w2_v)

    ref = facilitator_reference(x, w1_v, w1_g, b1, w2_v, w2_g, b2)

    # 1) exact f32 path (parity with torch.nn.GELU / weight_norm)
    out = facilitator_forward(x, w1_v, w1_g, b1, w2_v, w2_g, b2,
                              compute_dtype=jnp.float32)
    out = jax.block_until_ready(out)
    assert out.shape == (batch, out_dim)
    assert jnp.allclose(out, ref, atol=1e-5, rtol=1e-5), "f32 mismatch vs reference"

    # 2) default bf16-operand path, ragged batch -> 2 batch tiles (megacore split)
    big_batch = 300
    x2 = jax.random.normal(k_x2, (big_batch, in_dim), dtype=jnp.float32)
    ref2 = facilitator_reference(x2, w1_v, w1_g, b1, w2_v, w2_g, b2)
    out2 = facilitator_forward(x2, w1_v, w1_g, b1, w2_v, w2_g, b2)
    out2 = jax.block_until_ready(out2)
    assert out2.shape == (big_batch, out_dim)
    assert jnp.allclose(out2, ref2, atol=5e-2, rtol=5e-2), "bf16 mismatch vs reference"

    # 3) bf16 + tanh-approximate GELU (EUP path)
    out3 = facilitator_forward(x2, w1_v, w1_g, b1, w2_v, w2_g, b2,
                               approximate_gelu=True)
    out3 = jax.block_until_ready(out3)
    assert jnp.allclose(out3, ref2, atol=5e-2, rtol=5e-2), "approx-GELU mismatch"

    # 4) hidden-dim tiled path (accumulator across the hid grid axis), exact f32
    in4, hid4, out4d, batch4 = 32, 256, 32, 64
    b4_1 = 1.0 / math.sqrt(in4)
    w1_vb = jax.random.uniform(k_w1b, (hid4, in4), jnp.float32, -b4_1, b4_1)
    b1b = jax.random.uniform(k_b1b, (hid4,), jnp.float32, -b4_1, b4_1)
    w1_gb = jnp.linalg.norm(w1_vb)
    b4_2 = 1.0 / math.sqrt(hid4)
    w2_vb = jax.random.uniform(k_w2b, (out4d, hid4), jnp.float32, -b4_2, b4_2)
    b2b = jax.random.uniform(k_b2b, (out4d,), jnp.float32, -b4_2, b4_2)
    w2_gb = jnp.linalg.norm(w2_vb)
    x4 = jax.random.normal(k_x4, (batch4, in4), dtype=jnp.float32)

    ref4 = facilitator_reference(x4, w1_vb, w1_gb, b1b, w2_vb, w2_gb, b2b)
    out4 = facilitator_forward(x4, w1_vb, w1_gb, b1b, w2_vb, w2_gb, b2b,
                               compute_dtype=jnp.float32, hid_block=128)
    out4 = jax.block_until_ready(out4)
    assert out4.shape == (batch4, out4d)
    assert jnp.allclose(out4, ref4, atol=1e-4, rtol=1e-4), "hid-tiled mismatch"

    print("KERNEL_OK")
</pallas_src>

<mosaic_0001>
module attributes {stable_mosaic.version = 11 : i64} {
  func.func @kernel(%arg0: i32, %arg1: i32, %arg2: memref<2xf32, #tpu.memory_space<smem>>, %arg3: memref<8x128xf32, #tpu.memory_space<vmem>>, %arg4: memref<128x128xf32, #tpu.memory_space<vmem>>, %arg5: memref<1x128xf32, #tpu.memory_space<vmem>>, %arg6: memref<128x128xf32, #tpu.memory_space<vmem>>, %arg7: memref<1x128xf32, #tpu.memory_space<vmem>>, %arg8: memref<8x128xf32, #tpu.memory_space<vmem>>, %arg9: memref<8x128xf32, #tpu.memory_space<vmem>>) attributes {dimension_semantics = [#tpu.dimension_semantics<parallel>, #tpu.dimension_semantics<arbitrary>], iteration_bounds = array<i64: 1, 1>, scalar_prefetch = 1 : i64, scratch_operands = 1 : i64, tpu.core_type = #tpu.core_type<tc>, window_params = [{transform_indices = @transform_0, window_bounds = array<i64: 8, 128>}, {pipeline_mode = #tpu.pipeline_mode<synchronous>, transform_indices = @transform_1, window_bounds = array<i64: 128, 128>}, {pipeline_mode = #tpu.pipeline_mode<synchronous>, transform_indices = @transform_2, window_bounds = array<i64: 1, 128>}, {pipeline_mode = #tpu.pipeline_mode<synchronous>, transform_indices = @transform_3, window_bounds = array<i64: 128, 128>}, {pipeline_mode = #tpu.pipeline_mode<synchronous>, transform_indices = @transform_4, window_bounds = array<i64: 1, 128>}, {transform_indices = @transform_5, window_bounds = array<i64: 8, 128>}]} {
    %c0_i32 = arith.constant 0 : i32
    %0 = arith.cmpi eq, %arg1, %c0_i32 : i32
    %1 = arith.extui %0 : i1 to i32
    %c0_i32_0 = arith.constant 0 : i32
    %2 = arith.cmpi ne, %1, %c0_i32_0 : i32
    scf.if %2 {
      %cst_19 = arith.constant 0.000000e+00 : f32
      %31 = vector.broadcast %cst_19 : f32 to vector<8x128xf32>
      %c0_20 = arith.constant 0 : index
      %c0_21 = arith.constant 0 : index
      %32 = vector.load %arg9[%c0_20, %c0_21] : memref<8x128xf32, #tpu.memory_space<vmem>>, vector<8x128xf32>
      tpu.vector_store %arg9[%c0_20, %c0_21], %31 {strides = array<i32>} : memref<8x128xf32, #tpu.memory_space<vmem>>, vector<8x128xf32>,
    } else {
    }
    %c0 = arith.constant 0 : index
    %3 = memref.load %arg2[%c0] : memref<2xf32, #tpu.memory_space<smem>>
    %c1 = arith.constant 1 : index
    %4 = memref.load %arg2[%c1] : memref<2xf32, #tpu.memory_space<smem>>
    %c0_1 = arith.constant 0 : index
    %c0_2 = arith.constant 0 : index
    %5 = vector.load %arg3[%c0_1, %c0_2] : memref<8x128xf32, #tpu.memory_space<vmem>>, vector<8x128xf32>
    %c0_3 = arith.constant 0 : index
    %c0_4 = arith.constant 0 : index
    %6 = vector.load %arg4[%c0_3, %c0_4] : memref<128x128xf32, #tpu.memory_space<vmem>>, vector<128x128xf32>
    %cst = arith.constant dense<0.000000e+00> : vector<8x128xf32>
    %7 = tpu.matmul %5, %6, %cst {dimension_numbers = #tpu.dot_dimension_numbers<[1], [0], [0], [1], [0, 0, 1, 1], [], []>} : vector<8x128xf32>, vector<128x128xf32>, vector<8x128xf32> -> vector<8x128xf32>
    %8 = vector.broadcast %3 : f32 to vector<8x128xf32>
    %9 = arith.mulf %7, %8 : vector<8x128xf32>
    %c0_5 = arith.constant 0 : index
    %c0_6 = arith.constant 0 : index
    %10 = vector.load %arg5[%c0_5, %c0_6] : memref<1x128xf32, #tpu.memory_space<vmem>>, vector<1x128xf32>
    %11 = vector.broadcast %10 : vector<1x128xf32> to vector<8x128xf32>
    %12 = arith.addf %9, %11 : vector<8x128xf32>
    %cst_7 = arith.constant 5.000000e-01 : f32
    %13 = vector.broadcast %cst_7 : f32 to vector<8x128xf32>
    %14 = arith.mulf %13, %12 : vector<8x128xf32>
    %cst_8 = arith.constant 0.707106769 : f32
    %15 = vector.broadcast %cst_8 : f32 to vector<8x128xf32>
    %16 = arith.mulf %12, %15 : vector<8x128xf32>
    %17 = math.erf %16 : vector<8x128xf32>
    %cst_9 = arith.constant 1.000000e+00 : f32
    %18 = vector.broadcast %cst_9 : f32 to vector<8x128xf32>
    %19 = arith.addf %18, %17 : vector<8x128xf32>
    %20 = arith.mulf %14, %19 : vector<8x128xf32>
    %c0_10 = arith.constant 0 : index
    %c0_11 = arith.constant 0 : index
    %21 = vector.load %arg9[%c0_10, %c0_11] : memref<8x128xf32, #tpu.memory_space<vmem>>, vector<8x128xf32>
    %c0_12 = arith.constant 0 : index
    %c0_13 = arith.constant 0 : index
    %22 = vector.load %arg6[%c0_12, %c0_13] : memref<128x128xf32, #tpu.memory_space<vmem>>, vector<128x128xf32>
    %cst_14 = arith.constant dense<0.000000e+00> : vector<8x128xf32>
    %23 = tpu.matmul %20, %22, %cst_14 {dimension_numbers = #tpu.dot_dimension_numbers<[1], [0], [0], [1], [0, 0, 1, 1], [], []>} : vector<8x128xf32>, vector<128x128xf32>, vector<8x128xf32> -> vector<8x128xf32>
    %24 = vector.broadcast %4 : f32 to vector<8x128xf32>
    %25 = arith.mulf %23, %24 : vector<8x128xf32>
    %26 = arith.addf %21, %25 : vector<8x128xf32>
    %c0_15 = arith.constant 0 : index
    %c0_16 = arith.constant 0 : index
    %27 = vector.load %arg9[%c0_15, %c0_16] : memref<8x128xf32, #tpu.memory_space<vmem>>, vector<8x128xf32>
    tpu.vector_store %arg9[%c0_15, %c0_16], %26 {strides = array<i32>} : memref<8x128xf32, #tpu.memory_space<vmem>>, vector<8x128xf32>,
    %c0_i32_17 = arith.constant 0 : i32
    %28 = arith.cmpi eq, %arg1, %c0_i32_17 : i32
    %29 = arith.extui %28 : i1 to i32
    %c0_i32_18 = arith.constant 0 : i32
    %30 = arith.cmpi ne, %29, %c0_i32_18 : i32
    scf.if %30 {
      %c0_19 = arith.constant 0 : index
      %c0_20 = arith.constant 0 : index
      %31 = vector.load %arg9[%c0_19, %c0_20] : memref<8x128xf32, #tpu.memory_space<vmem>>, vector<8x128xf32>
      %c0_21 = arith.constant 0 : index
      %c0_22 = arith.constant 0 : index
      %32 = vector.load %arg7[%c0_21, %c0_22] : memref<1x128xf32, #tpu.memory_space<vmem>>, vector<1x128xf32>
      %33 = vector.broadcast %32 : vector<1x128xf32> to vector<8x128xf32>
      %34 = arith.addf %31, %33 : vector<8x128xf32>
      %c0_23 = arith.constant 0 : index
      %c0_24 = arith.constant 0 : index
      %35 = vector.load %arg8[%c0_23, %c0_24] : memref<8x128xf32, #tpu.memory_space<vmem>>, vector<8x128xf32>
      tpu.vector_store %arg8[%c0_23, %c0_24], %34 {strides = array<i32>} : memref<8x128xf32, #tpu.memory_space<vmem>>, vector<8x128xf32>,
    } else {
    }
    return
  }
  func.func @transform_0(%arg0: i32, %arg1: i32, %arg2: memref<2xf32, #tpu.memory_space<smem>>) -> (i32, i32) {
    %c0_i32 = arith.constant 0 : i32
    %c0_i32_0 = arith.constant 0 : i32
    return %arg0, %c0_i32 : i32, i32
  }
  func.func @transform_1(%arg0: i32, %arg1: i32, %arg2: memref<2xf32, #tpu.memory_space<smem>>) -> (i32, i32) {
    %c0_i32 = arith.constant 0 : i32
    %c0_i32_0 = arith.constant 0 : i32
    return %c0_i32, %arg1 : i32, i32
  }
  func.func @transform_2(%arg0: i32, %arg1: i32, %arg2: memref<2xf32, #tpu.memory_space<smem>>) -> (i32, i32) {
    %c0_i32 = arith.constant 0 : i32
    %c0_i32_0 = arith.constant 0 : i32
    return %c0_i32, %arg1 : i32, i32
  }
  func.func @transform_3(%arg0: i32, %arg1: i32, %arg2: memref<2xf32, #tpu.memory_space<smem>>) -> (i32, i32) {
    %c0_i32 = arith.constant 0 : i32
    %c0_i32_0 = arith.constant 0 : i32
    return %arg1, %c0_i32 : i32, i32
  }
  func.func @transform_4(%arg0: i32, %arg1: i32, %arg2: memref<2xf32, #tpu.memory_space<smem>>) -> (i32, i32) {
    %c0_i32 = arith.constant 0 : i32
    %c0_i32_0 = arith.constant 0 : i32
    %c0_i32_1 = arith.constant 0 : i32
    return %c0_i32, %c0_i32_0 : i32, i32
  }
  func.func @transform_5(%arg0: i32, %arg1: i32, %arg2: memref<2xf32, #tpu.memory_space<smem>>) -> (i32, i32) {
    %c0_i32 = arith.constant 0 : i32
    %c0_i32_0 = arith.constant 0 : i32
    return %arg0, %c0_i32 : i32, i32
  }
}

</mosaic_0001>

<bundles_post_ra>
// kernel: tpu_custom_call.1
= control target key start
LH: loop header
LB: loop body
LE: loop exit
PB: predicated region body
PF: predicated region fallthrough
CT: control target
= control target key end

     0   :  { %s368_s24 = smov [#allocation4]   ;;  %s431_s0 = inlined_call_operand.hbm [shape: f32[2], index: 0, kind: input, shape index: {}]   ;;  %s432_s1 = inlined_call_operand.hbm [shape: f32[8,128], index: 1, kind: input, shape index: {}]   ;;  %s433_s2 = inlined_call_operand.hbm [shape: f32[128,128], index: 2, kind: input, shape index: {}]   ;;  %s434_s3 = inlined_call_operand.vmem [shape: f32[1,128], index: 3, kind: input, shape index: {}]   ;;  %s435_s4 = inlined_call_operand.hbm [shape: f32[128,128], index: 4, kind: input, shape index: {}]   ;;  %s436_s5 = inlined_call_operand.vmem [shape: f32[1,128], index: 5, kind: input, shape index: {}]   ;;  %s437_s6 = inlined_call_operand.hbm [shape: f32[8,128], index: 6, kind: output, shape index: {}]  }
   0x1   :  { %s12_s23 = sshll.u32 %s431_s0, 4  ;;  %s13_s23 = int_to_ptr.hbm [resolvable:$true] %s12_s23 }
   0x2   :  { %15 = dma.hbm_to_smem %s13_s23, 16, %s368_s24, [#allocation3] }
   0x3   :  { %360 = dma.done.wait [#allocation3], 16 }
   0x4   :  { %361 = vsyncadd [#allocation3], 4294967280 }
   0x5   :  { %18 = sfence }
   0x6   :  { %19 = vsyncpa [#allocation6], 0 }
   0x7   :  { %20 = vsyncpa [#allocation9], 0  ;;  %s37_s27 = sshll.u32 %s433_s2, 4  ;;  %s38_s27 = int_to_ptr.hbm [resolvable:$true] %s37_s27 }
   0x8   :  { %21 = vsyncpa [#allocation7], 0  ;;  %s369_s28 = smov [#allocation8]   ;;  %s27_s0 = sshll.u32 %s432_s1, 4  ;;  %s28_s0 = int_to_ptr.hbm [resolvable:$true] %s27_s0 }
   0x9   :  { %s39_s29 = sshll.u32 %s369_s28, 4  ;;  %s370_s8 = smov 128   ;;  %s40_s29 = int_to_ptr.vmem [resolvable:$true] %s39_s29 }
   0xa   :  { %s371_s9 = smov 8   ;;  %s372_s10 = smov [#allocation5]  }
   0xb   :  { %45 = dma.hbm_to_vmem [thread:$0]  %s38_s27, 2048, %s40_s29, [#allocation9], %s370_s8, %s370_s8, %s371_s9  }
   0xc   :  { %s29_s11 = sshll.u32 %s372_s10, 4  ;;  %s52_s14 = sshll.u32 %s435_s4, 4  ;;  %s30_s11 = int_to_ptr.vmem [resolvable:$true] %s29_s11  ;;  %s53_s14 = int_to_ptr.hbm [resolvable:$true] %s52_s14 }
   0xd   :  { %32 = dma.hbm_to_vmem [thread:$0]  %s28_s0, 128, %s30_s11, [#allocation6]  }
   0xe   :  { %s373_s2 = smov [#allocation10]  }
   0xf   :  { %s54_s15 = sshll.u32 %s373_s2, 4  ;;  %s55_s15 = int_to_ptr.vmem [resolvable:$true] %s54_s15 }
  0x10   :  { %60 = dma.hbm_to_vmem [thread:$0]  %s53_s14, 2048, %s55_s15, [#allocation9], %s370_s8, %s370_s8, %s371_s9  }
  0x11   :  { %362 = dma.done.wait [#allocation6], 128  }
  0x12   :  { %363 = vsyncadd [#allocation6], 4294967168 }
  0x13   :  { %364 = dma.done.wait [#allocation9], 4096  }
  0x14   :  { %365 = vsyncadd [#allocation9], 4294963200  ;;  %v98_v0 = vld [vmem:[#allocation8 + $0x78] sm:$0xff]  ;;  %v97_v1 = vld [vmem:[#allocation8 + $0x70] sm:$0xff]  ;;  %s80_s1 = sld [smem:[#allocation4]]  ;;  %s374_s19 = smov [#allocation11]  }
  0x15   :  { %99 = vmatpush.msra.mxu0 %v98_v0  ;;  %v96_v2 = vld [vmem:[#allocation8 + $0x68] sm:$0xff]  ;;  %v95_v3 = vld [vmem:[#allocation8 + $0x60] sm:$0xff]  ;;  %v94_v4 = vld [vmem:[#allocation8 + $0x58] sm:$0xff]  ;;  %s226_s20 = sshll.u32 %s374_s19, 4  ;;  %s228_s23 = sshll.u32 %s437_s6, 4  ;;  %s227_s20 = int_to_ptr.vmem [resolvable:$true] %s226_s20  ;;  %s229_s23 = int_to_ptr.hbm [resolvable:$true] %s228_s23 }
  0x16   :  { %v93_v5 = vld [vmem:[#allocation8 + $0x50] sm:$0xff]  ;;  %v92_v6 = vld [vmem:[#allocation8 + $0x48] sm:$0xff]  ;;  %v91_v7 = vld [vmem:[#allocation8 + $0x40] sm:$0xff] }
  0x17   :  { %100 = vmatpush.msra.mxu0 %v97_v1  ;;  %v90_v8 = vld [vmem:[#allocation8 + $0x38] sm:$0xff]  ;;  %v89_v9 = vld [vmem:[#allocation8 + $0x30] sm:$0xff]  ;;  %v88_v10 = vld [vmem:[#allocation8 + $0x28] sm:$0xff] }
  0x18   :  { %v87_v11 = vld [vmem:[#allocation8 + $0x20] sm:$0xff]  ;;  %v86_v12 = vld [vmem:[#allocation8 + $0x18] sm:$0xff]  ;;  %v85_v13 = vld [vmem:[#allocation8 + $0x10] sm:$0xff] }
  0x19   :  { %101 = vmatpush.msra.mxu0 %v96_v2  ;;  %v84_v14 = vld [vmem:[#allocation8 + $0x8] sm:$0xff]  ;;  %v83_v15 = vld [vmem:[#allocation8] sm:$0xff]  ;;  %v82_v16 = vld [vmem:[#allocation5] sm:$0xff] }
  0x1a   :  { %v186_v17 = vld [vmem:[#allocation10 + $0x78] sm:$0xff]  ;;  %v185_v18 = vld [vmem:[#allocation10 + $0x70] sm:$0xff]  ;;  %v184_v19 = vld [vmem:[#allocation10 + $0x68] sm:$0xff]  ;;  %v119_v29 = vstv %s80_s1 }
  0x1b   :  { %102 = vmatpush.msra.mxu0 %v95_v3  ;;  %187 = vmatpush.msra.mxu1 %v186_v17  ;;  %v183_v20 = vld [vmem:[#allocation10 + $0x60] sm:$0xff]  ;;  %v182_v21 = vld [vmem:[#allocation10 + $0x58] sm:$0xff]  ;;  %v181_v22 = vld [vmem:[#allocation10 + $0x50] sm:$0xff] }
  0x1c   :  { %v180_v23 = vld [vmem:[#allocation10 + $0x48] sm:$0xff]  ;;  %v179_v24 = vld [vmem:[#allocation10 + $0x40] sm:$0xff]  ;;  %v178_v25 = vld [vmem:[#allocation10 + $0x38] sm:$0xff] }
  0x1d   :  { %103 = vmatpush.msra.mxu0 %v94_v4  ;;  %188 = vmatpush.msra.mxu1 %v185_v18  ;;  %v177_v26 = vld [vmem:[#allocation10 + $0x30] sm:$0xff]  ;;  %v176_v27 = vld [vmem:[#allocation10 + $0x28] sm:$0xff]  ;;  %v175_v28 = vld [vmem:[#allocation10 + $0x20] sm:$0xff] }
  0x1e   :  { %v248_v30 = vld [vmem:[%s434_s3] ss:$0 sm:$0xff]  ;;  %v173_v34 = vld [vmem:[#allocation10 + $0x10] sm:$0xff]  ;;  %v172_v36 = vld [vmem:[#allocation10 + $0x8] sm:$0xff]  ;;  %s239_s3 = sld [smem:[#allocation4 + $0x1]] }
  0x1f   :  { %104 = vmatpush.msra.mxu0 %v93_v5  ;;  %189 = vmatpush.msra.mxu1 %v184_v19  ;;  %v174_v31 = vld [vmem:[#allocation10 + $0x18] sm:$0xff]  ;;  %v171_v38 = vld [vmem:[#allocation10] sm:$0xff] }
  0x21   :  { %105 = vmatpush.msra.mxu0 %v92_v6  ;;  %190 = vmatpush.msra.mxu1 %v183_v20 }
  0x23   :  { %106 = vmatpush.msra.mxu0 %v91_v7  ;;  %191 = vmatpush.msra.mxu1 %v182_v21 }
  0x25   :  { %107 = vmatpush.msra.mxu0 %v90_v8  ;;  %192 = vmatpush.msra.mxu1 %v181_v22 }
  0x27   :  { %108 = vmatpush.msra.mxu0 %v89_v9  ;;  %193 = vmatpush.msra.mxu1 %v180_v23 }
  0x29   :  { %109 = vmatpush.msra.mxu0 %v88_v10  ;;  %194 = vmatpush.msra.mxu1 %v179_v24 }
  0x2b   :  { %110 = vmatpush.msra.mxu0 %v87_v11  ;;  %195 = vmatpush.msra.mxu1 %v178_v25 }
  0x2d   :  { %111 = vmatpush.msra.mxu0 %v86_v12  ;;  %196 = vmatpush.msra.mxu1 %v177_v26 }
  0x2f   :  { %112 = vmatpush.msra.mxu0 %v85_v13  ;;  %197 = vmatpush.msra.mxu1 %v176_v27  ;;  %v207_v13 = vstv %s239_s3 }
  0x31   :  { %113 = vmatpush.msra.mxu0 %v84_v14  ;;  %198 = vmatpush.msra.mxu1 %v175_v28  ;;  %v249_v14 = vld [vmem:[%s436_s5] ss:$0 sm:$0xff] }
  0x33   :  { %114 = vmatpush.msra.mxu0 %v83_v15  ;;  %199 = vmatpush.msra.mxu1 %v174_v31 }
  0x34   :  { %115 = vmatmul.f32.vlgmr.msra.gmra.mxu0 %v82_v16 }
  0x35   :  { %200 = vmatpush.msra.mxu1 %v173_v34 }
  0x37   :  { %201 = vmatpush.msra.mxu1 %v172_v36 }
  0x39   :  { %202 = vmatpush.msra.mxu1 %v171_v38 }
  0xb1   :  { %v116_v32 = vpop.f32.mrf.mxu0 }
  0xb2   :  { %v120_v33 = vmul.f32 %v119_v29, %v116_v32 }
  0xb4   :  { %v125_v35 = vadd.f32 %v248_v30, %v120_v33 }
  0xb6   :  { %v127_v37 = vmul.f32 0.70710677, %v125_v35  ;;  %v126_v10 = vmul.f32 0.5, %v125_v35 }
  0xb8   :  { %v128_v39 = vmul.f32 %v127_v37, %v127_v37 }
  0xba   :  { %v129_v40 = vmin.f32 %v128_v39, 16.0 }
  0xbc   :  { %v130_v41 = vmul.f32 2.1237322e-06, %v129_v40  ;;  %v141_v42 = vmul.f32 3.8918573e-05, %v129_v40 }
  0xbe   :  { %v131_v43 = vadd.f32 0.00028619796, %v130_v41  ;;  %v142_v44 = vadd.f32 0.001143296, %v141_v42 }
  0xc0   :  { %v132_v45 = vmul.f32 %v131_v43, %v129_v40  ;;  %v143_v46 = vmul.f32 %v142_v44, %v129_v40 }
  0xc2   :  { %v144_v47 = vadd.f32 0.014752088, %v143_v46  ;;  %v133_v48 = vadd.f32 0.0036580483, %v132_v45 }
  0xc4   :  { %v145_v49 = vmul.f32 %v144_v47, %v129_v40  ;;  %v134_v51 = vmul.f32 %v133_v48, %v129_v40 }
  0xc6   :  { %v146_v50 = vadd.f32 0.112945676, %v145_v49  ;;  %v135_v54 = vadd.f32 0.05243302, %v134_v51 }
  0xc8   :  { %v147_v52 = vmul.f32 %v146_v50, %v129_v40  ;;  %v136_v57 = vmul.f32 %v135_v54, %v129_v40 }
  0xca   :  { %v148_v53 = vadd.f32 0.4994258, %v147_v52  ;;  %v137_v58 = vadd.f32 0.18741608, %v136_v57 }
  0xcc   :  { %v149_v55 = vmul.f32 %v148_v53, %v129_v40  ;;  %v138_v60 = vmul.f32 %v137_v58, %v129_v40 }
  0xce   :  { %v150_v56 = vadd.f32 1.0, %v149_v55  ;;  %v139_v0 = vadd.f32 1.1283791, %v138_v60 }
  0xd0   :  { %250 = vrcp.f32 %v150_v56  ;;  %v162_v63 = vand.u32 2147483648, %v150_v56  ;;  %v160_v2 = vand.u32 2147483647, %v150_v56  ;;  %vm156_vm1 = vweird.f32 %v150_v56 }
  0xd1   :  { %v140_v5 = vmul.f32 %v139_v0, %v127_v37 }
  0xd2   :  { %v163_v4 = vor.u32 1.1754944e-38, %v162_v63  ;;  %vm161_vm3 = vcmp.eq.f32.partialorder %v160_v2, 8.507059e+37 }
  0xd6   :  { %v251_v59 = vpop.eup %250 }
  0xd7   :  { %v152_v61 = vmul.f32 %v251_v59, %v150_v56  ;;  %vm157_vm0 = vweird.f32 %v251_v59 }
  0xd8   :  { %vm158_vm2 = vmor %vm156_vm1, %vm157_vm0 }
  0xd9   :  { %v153_v62 = vsub.f32 1.0, %v152_v61 }
  0xdb   :  { %v154_v1 = vmul.f32 %v251_v59, %v153_v62 }
  0xdd   :  { %v155_v3 = vadd.f32 %v251_v59, %v154_v1 }
  0xdf   :  { %v159_v6 = vsel %vm158_vm2, %v251_v59, %v155_v3 }
  0xe0   :  { %v164_v7 = vsel %vm161_vm3, %v163_v4, %v159_v6 }
  0xe1   :  { %v165_v8 = vmul.f32 %v164_v7, %v140_v5 }
  0xe3   :  { %v240_v9 = vclamps-f32 %v165_v8, 1.0 }
  0xe5   :  { %v168_v11 = vadd.f32 1.0, %v240_v9 }
  0xe7   :  { %v169_v12 = vmul.f32 %v168_v11, %v126_v10 }
  0xe9   :  { %203 = vmatmul.f32.vlgmr.msra.gmra.mxu1 %v169_v12 }
 0x166   :  { %v204_v15 = vpop.f32.mrf.mxu1 }
 0x167   :  { %v208_v16 = vmul.f32 %v207_v13, %v204_v15 }
 0x169   :  { %v219_v17 = vadd.f32 %v249_v14, %v208_v16 }
 0x16b   :  { %220 = vst [vmem:[#allocation11] sm:$0xff] %v219_v17 }
 0x16c   :  { %231 = dma.vmem_to_hbm [thread:$0]  %s227_s20, 128, %s229_s23, [#allocation7]  }
 0x16d   :  { %366 = dma.done.wait [#allocation7], 128  }
 0x16e   :  { %367 = vsyncadd [#allocation7], 4294967168 }
 0x16f   :  { %236 = vsyncpa [#allocation6], 1 }
 0x170   :  { %237 = vsyncpa [#allocation9], 1 }
 0x171   :  { %238 = vsyncpa [#allocation7], 1 }

</bundles_post_ra>
